<compile_context>
chip_gen: v7x
topology: tpu7x:2x2x1
jax: 0.10.0
libtpu: 0.0.40
codegen_flags: <defaults>
</compile_context>

<pallas_src>
import functools

import jax
import jax.numpy as jnp
from jax.experimental import pallas as pl
from jax.experimental.pallas import tpu as pltpu


def _round_up(x, m):
    return (x + m - 1) // m * m


def _default_bf16_epilogue():
    """Enable the bf16 bias+LeakyReLU epilogue only on chips with a bf16 VPU (v6e/v7x)."""
    try:
        kind = jax.devices()[0].device_kind.lower()
    except Exception:
        return False
    return ("v6" in kind) or ("v7" in kind)


def gnet_kernel(zT_ref, w1_ref, b1_ref, w2_ref, b2_ref, w3_ref, b3_ref, out_ref,
                *, bf16_epilogue: bool):
    """One batch tile. Activations are [features, TB] (batch on the lane dim)."""
    epi = jnp.bfloat16 if bf16_epilogue else jnp.float32

    # Layer 1: Linear(z_dim -> latent). MXU bf16 in, f32 accumulate.
    h = jnp.dot(w1_ref[...], zT_ref[...], preferred_element_type=jnp.float32)
    h = h.astype(epi) + b1_ref[...].astype(epi)     # (LP, 1) lane-broadcast bias
    h = jnp.maximum(h, 0.1 * h)                     # LeakyReLU(0.1): single VALU max

    # Layer 2: Linear(latent -> latent). astype is a no-op when the epilogue is bf16.
    h = jnp.dot(w2_ref[...], h.astype(jnp.bfloat16),
                preferred_element_type=jnp.float32)
    h = h.astype(epi) + b2_ref[...].astype(epi)
    h = jnp.maximum(h, 0.1 * h)

    # Layer 3: Linear(latent -> 1) on the MXU. w3 is padded to a (16, LP) bf16 row
    # block (row 0 = real weights, rows 1..15 zero), so the degenerate N=1 reduce
    # becomes a cheap (16,LP)x(LP,TB) matmul; keep row 0 -> lane-dense (1, TB) store.
    out = jnp.dot(w3_ref[...], h.astype(jnp.bfloat16),
                  preferred_element_type=jnp.float32)          # (16, TB) f32
    out_ref[...] = (out[0:1, :] + b3_ref[0, 0]).astype(out_ref.dtype)


def init_params(key, z_dim, latent_dim):
    """PyTorch-layout params (W: [out, in], b: [out]), Kaiming-uniform-like nn.Linear init."""
    ks = jax.random.split(key, 6)

    def linear_init(kw, kb, fan_in, fan_out):
        bound = 1.0 / jnp.sqrt(jnp.float32(fan_in))
        w = jax.random.uniform(kw, (fan_out, fan_in), jnp.float32, -bound, bound)
        b = jax.random.uniform(kb, (fan_out,), jnp.float32, -bound, bound)
        return w, b

    w1, b1 = linear_init(ks[0], ks[1], z_dim, latent_dim)
    w2, b2 = linear_init(ks[2], ks[3], latent_dim, latent_dim)
    w3, b3 = linear_init(ks[4], ks[5], latent_dim, 1)
    return (w1, b1, w2, b2, w3, b3)


def prepare_params(params):
    """One-time prep: zero-pad to TPU-aligned shapes (math-exact) and cast MXU weights
    to bf16.  NOTE: padding correctness relies on LeakyReLU(0) == 0 and zero-padded
    bias rows, so the padded latent rows stay exactly zero through layers 2/3."""
    w1, b1, w2, b2, w3, b3 = params          # PyTorch layout
    L, Z = w1.shape
    LP = _round_up(L, 64)        # latent 50 -> 64 (bf16 sublane tile = 16, halves VALU work vs 128)
    ZP = _round_up(Z, 16)        # z_dim padded for bf16 sublane packing of zT

    def pad2(a, r, c):
        return jnp.pad(a, ((0, r - a.shape[0]), (0, c - a.shape[1])))

    w1_p = pad2(w1, LP, ZP).astype(jnp.bfloat16)                 # (LP, ZP)
    b1_p = pad2(b1.reshape(L, 1), LP, 1).astype(jnp.float32)     # (LP, 1)
    w2_p = pad2(w2, LP, LP).astype(jnp.bfloat16)                 # (LP, LP)
    b2_p = pad2(b2.reshape(L, 1), LP, 1).astype(jnp.float32)     # (LP, 1)
    w3_p = pad2(w3.reshape(1, L), 16, LP).astype(jnp.bfloat16)   # (16, LP), row 0 real
    b3_p = b3.reshape(1, 1).astype(jnp.float32)                  # (1, 1) -> SMEM scalar
    return (w1_p, b1_p, w2_p, b2_p, w3_p, b3_p)


@functools.partial(jax.jit, static_argnames=("tb", "bf16_epilogue"))
def _g_net_forward_impl(z, kparams, *, tb, bf16_epilogue):
    w1_p, b1_p, w2_p, b2_p, w3_p, b3_p = kparams
    B, Z = z.shape
    LP, ZP = w1_p.shape

    # Big batch tiles amortize the ~0.35 us per-grid-step overhead; clamp for small B,
    # and keep >= 2 grid steps when the batch allows it so both v7x TensorCores work.
    tb = max(128, min(tb, _round_up(B, 128)))
    BP = _round_up(B, tb)
    if BP // tb < 2 and BP >= 256:
        tb = _round_up(BP // 2, 128)
        BP = _round_up(B, tb)
    n_tiles = BP // tb

    # Batch on the lane dimension; cast once to bf16 (halves z DMA traffic).
    # In production this pad/transpose/cast should be fused into the producer of z.
    zT = jnp.pad(z, ((0, BP - B), (0, ZP - Z))).T.astype(jnp.bfloat16)   # (ZP, BP)

    kernel = functools.partial(gnet_kernel, bf16_epilogue=bf16_epilogue)

    out = pl.pallas_call(
        kernel,
        out_shape=jax.ShapeDtypeStruct((1, BP), jnp.float32),
        grid=(n_tiles,),
        in_specs=[
            pl.BlockSpec((ZP, tb), lambda i: (0, i)),   # zT: streamed per batch tile
            pl.BlockSpec((LP, ZP), lambda i: (0, 0)),   # w1: VMEM-resident
            pl.BlockSpec((LP, 1), lambda i: (0, 0)),    # b1
            pl.BlockSpec((LP, LP), lambda i: (0, 0)),   # w2
            pl.BlockSpec((LP, 1), lambda i: (0, 0)),    # b2
            pl.BlockSpec((16, LP), lambda i: (0, 0)),   # w3 row-block (row 0 real)
            pl.BlockSpec(memory_space=pltpu.MemorySpace.SMEM),  # b3 scalar in SMEM
        ],
        out_specs=pl.BlockSpec((1, tb), lambda i: (0, i)),      # lane-dense output
        compiler_params=pltpu.CompilerParams(
            dimension_semantics=("parallel",),
        ),
    )(zT, w1_p, b1_p, w2_p, b2_p, w3_p, b3_p)

    return out[0, :B].reshape(B, 1)


def g_net_forward(z, kparams, *, tb=4096, bf16_epilogue=None):
    """z: [B, z_dim] f32 -> [B, 1] f32 using prepared (padded/bf16) params."""
    if bf16_epilogue is None:
        bf16_epilogue = _default_bf16_epilogue()
    return _g_net_forward_impl(z, kparams, tb=tb, bf16_epilogue=bool(bf16_epilogue))


def g_net_reference(z, params):
    """Pure-f32 reference matching the PyTorch G_net forward."""
    w1, b1, w2, b2, w3, b3 = params
    h = z @ w1.T + b1
    h = jnp.maximum(h, 0.1 * h)
    h = h @ w2.T + b2
    h = jnp.maximum(h, 0.1 * h)
    return h @ w3.T + b3


if __name__ == "__main__":
    key = jax.random.PRNGKey(0)
    k_z, k_p = jax.random.split(key)

    batch = 8
    z_dim = 16
    latent_dim = 50  # latent_dim_n in the PyTorch module

    z = jax.random.normal(k_z, (batch, z_dim), dtype=jnp.float32)
    params = init_params(k_p, z_dim, latent_dim)
    kparams = prepare_params(params)

    out = g_net_forward(z, kparams)
    out = jax.block_until_ready(out)

    ref = g_net_reference(z, params)
    assert out.shape == (batch, 1), out.shape
    # Kernel uses bf16 MXU inputs with f32 accumulation (and a bf16 epilogue on
    # v6e/v7x), so compare against the strict f32 reference with a loose tolerance.
    assert jnp.allclose(out, ref, atol=3e-2, rtol=3e-2), (out, ref)

    print("KERNEL_OK")
</pallas_src>

<mosaic_0001>
module attributes {stable_mosaic.version = 11 : i64} {
  func.func @gnet_kernel(%arg0: i32, %arg1: memref<16x128xbf16, #tpu.memory_space<vmem>>, %arg2: memref<64x16xbf16, #tpu.memory_space<vmem>>, %arg3: memref<64x1xf32, #tpu.memory_space<vmem>>, %arg4: memref<64x64xbf16, #tpu.memory_space<vmem>>, %arg5: memref<64x1xf32, #tpu.memory_space<vmem>>, %arg6: memref<16x64xbf16, #tpu.memory_space<vmem>>, %arg7: memref<1x1xf32, #tpu.memory_space<smem>>, %arg8: memref<1x128xf32, #tpu.memory_space<vmem>>) attributes {dimension_semantics = [#tpu.dimension_semantics<parallel>], iteration_bounds = array<i64: 1>, scalar_prefetch = 0 : i64, scratch_operands = 0 : i64, tpu.core_type = #tpu.core_type<tc>, window_params = [{transform_indices = @transform_0, window_bounds = array<i64: 16, 128>}, {pipeline_mode = #tpu.pipeline_mode<synchronous>, transform_indices = @transform_1, window_bounds = array<i64: 64, 16>}, {pipeline_mode = #tpu.pipeline_mode<synchronous>, transform_indices = @transform_2, window_bounds = array<i64: 64, 1>}, {pipeline_mode = #tpu.pipeline_mode<synchronous>, transform_indices = @transform_3, window_bounds = array<i64: 64, 64>}, {pipeline_mode = #tpu.pipeline_mode<synchronous>, transform_indices = @transform_4, window_bounds = array<i64: 64, 1>}, {pipeline_mode = #tpu.pipeline_mode<synchronous>, transform_indices = @transform_5, window_bounds = array<i64: 16, 64>}, {transform_indices = @transform_6, window_bounds = array<i64: 1, 1>}, {transform_indices = @transform_7, window_bounds = array<i64: 1, 128>}]} {
    %c0 = arith.constant 0 : index
    %c0_0 = arith.constant 0 : index
    %0 = vector.load %arg2[%c0, %c0_0] : memref<64x16xbf16, #tpu.memory_space<vmem>>, vector<64x16xbf16>
    %c0_1 = arith.constant 0 : index
    %c0_2 = arith.constant 0 : index
    %1 = vector.load %arg1[%c0_1, %c0_2] : memref<16x128xbf16, #tpu.memory_space<vmem>>, vector<16x128xbf16>
    %cst = arith.constant dense<0.000000e+00> : vector<64x128xf32>
    %2 = tpu.matmul %0, %1, %cst {dimension_numbers = #tpu.dot_dimension_numbers<[1], [0], [0], [1], [0, 0, 1, 1], [], []>} : vector<64x16xbf16>, vector<16x128xbf16>, vector<64x128xf32> -> vector<64x128xf32>
    %c0_3 = arith.constant 0 : index
    %c0_4 = arith.constant 0 : index
    %3 = vector.load %arg3[%c0_3, %c0_4] : memref<64x1xf32, #tpu.memory_space<vmem>>, vector<64x1xf32>
    %4 = vector.broadcast %3 : vector<64x1xf32> to vector<64x128xf32>
    %5 = arith.addf %2, %4 : vector<64x128xf32>
    %cst_5 = arith.constant 1.000000e-01 : f32
    %6 = vector.broadcast %cst_5 : f32 to vector<64x128xf32>
    %7 = arith.mulf %6, %5 : vector<64x128xf32>
    %8 = arith.maximumf %5, %7 : vector<64x128xf32>
    %c0_6 = arith.constant 0 : index
    %c0_7 = arith.constant 0 : index
    %9 = vector.load %arg4[%c0_6, %c0_7] : memref<64x64xbf16, #tpu.memory_space<vmem>>, vector<64x64xbf16>
    %10 = arith.truncf %8 : vector<64x128xf32> to vector<64x128xbf16>
    %cst_8 = arith.constant dense<0.000000e+00> : vector<64x128xf32>
    %11 = tpu.matmul %9, %10, %cst_8 {dimension_numbers = #tpu.dot_dimension_numbers<[1], [0], [0], [1], [0, 0, 1, 1], [], []>} : vector<64x64xbf16>, vector<64x128xbf16>, vector<64x128xf32> -> vector<64x128xf32>
    %c0_9 = arith.constant 0 : index
    %c0_10 = arith.constant 0 : index
    %12 = vector.load %arg5[%c0_9, %c0_10] : memref<64x1xf32, #tpu.memory_space<vmem>>, vector<64x1xf32>
    %13 = vector.broadcast %12 : vector<64x1xf32> to vector<64x128xf32>
    %14 = arith.addf %11, %13 : vector<64x128xf32>
    %cst_11 = arith.constant 1.000000e-01 : f32
    %15 = vector.broadcast %cst_11 : f32 to vector<64x128xf32>
    %16 = arith.mulf %15, %14 : vector<64x128xf32>
    %17 = arith.maximumf %14, %16 : vector<64x128xf32>
    %c0_12 = arith.constant 0 : index
    %c0_13 = arith.constant 0 : index
    %18 = vector.load %arg6[%c0_12, %c0_13] : memref<16x64xbf16, #tpu.memory_space<vmem>>, vector<16x64xbf16>
    %19 = arith.truncf %17 : vector<64x128xf32> to vector<64x128xbf16>
    %cst_14 = arith.constant dense<0.000000e+00> : vector<16x128xf32>
    %20 = tpu.matmul %18, %19, %cst_14 {dimension_numbers = #tpu.dot_dimension_numbers<[1], [0], [0], [1], [0, 0, 1, 1], [], []>} : vector<16x64xbf16>, vector<64x128xbf16>, vector<16x128xf32> -> vector<16x128xf32>
    %21 = vector.extract_strided_slice %20 {offsets = [0, 0], sizes = [1, 128], strides = [1, 1]} : vector<16x128xf32> to vector<1x128xf32>
    %c0_15 = arith.constant 0 : index
    %c0_16 = arith.constant 0 : index
    %22 = memref.load %arg7[%c0_15, %c0_16] : memref<1x1xf32, #tpu.memory_space<smem>>
    %23 = vector.broadcast %22 : f32 to vector<1x128xf32>
    %24 = arith.addf %21, %23 : vector<1x128xf32>
    %c0_17 = arith.constant 0 : index
    %c0_18 = arith.constant 0 : index
    %25 = vector.load %arg8[%c0_17, %c0_18] : memref<1x128xf32, #tpu.memory_space<vmem>>, vector<1x128xf32>
    tpu.vector_store %arg8[%c0_17, %c0_18], %24 {strides = array<i32>} : memref<1x128xf32, #tpu.memory_space<vmem>>, vector<1x128xf32>,
    return
  }
  func.func @transform_0(%arg0: i32) -> (i32, i32) {
    %c0_i32 = arith.constant 0 : i32
    %c0_i32_0 = arith.constant 0 : i32
    return %c0_i32, %arg0 : i32, i32
  }
  func.func @transform_1(%arg0: i32) -> (i32, i32) {
    %c0_i32 = arith.constant 0 : i32
    %c0_i32_0 = arith.constant 0 : i32
    %c0_i32_1 = arith.constant 0 : i32
    return %c0_i32, %c0_i32_0 : i32, i32
  }
  func.func @transform_2(%arg0: i32) -> (i32, i32) {
    %c0_i32 = arith.constant 0 : i32
    %c0_i32_0 = arith.constant 0 : i32
    %c0_i32_1 = arith.constant 0 : i32
    return %c0_i32, %c0_i32_0 : i32, i32
  }
  func.func @transform_3(%arg0: i32) -> (i32, i32) {
    %c0_i32 = arith.constant 0 : i32
    %c0_i32_0 = arith.constant 0 : i32
    %c0_i32_1 = arith.constant 0 : i32
    return %c0_i32, %c0_i32_0 : i32, i32
  }
  func.func @transform_4(%arg0: i32) -> (i32, i32) {
    %c0_i32 = arith.constant 0 : i32
    %c0_i32_0 = arith.constant 0 : i32
    %c0_i32_1 = arith.constant 0 : i32
    return %c0_i32, %c0_i32_0 : i32, i32
  }
  func.func @transform_5(%arg0: i32) -> (i32, i32) {
    %c0_i32 = arith.constant 0 : i32
    %c0_i32_0 = arith.constant 0 : i32
    %c0_i32_1 = arith.constant 0 : i32
    return %c0_i32, %c0_i32_0 : i32, i32
  }
  func.func @transform_6(%arg0: i32) -> (i32, i32) {
    %c0_i32 = arith.constant 0 : i32
    %c0_i32_0 = arith.constant 0 : i32
    %c0_i32_1 = arith.constant 0 : i32
    return %c0_i32, %c0_i32_0 : i32, i32
  }
  func.func @transform_7(%arg0: i32) -> (i32, i32) {
    %c0_i32 = arith.constant 0 : i32
    %c0_i32_0 = arith.constant 0 : i32
    return %c0_i32, %arg0 : i32, i32
  }
}

</mosaic_0001>

<bundles_post_ra>
// kernel: _g_net_forward_impl.1
= control target key start
LH: loop header
LB: loop body
LE: loop exit
PB: predicated region body
PF: predicated region fallthrough
CT: control target
= control target key end

     0   :  { %vm112_vm0 = vcmask 130048   ;;  %v532_v1 = vmov 0   ;;  %vm286_vm1 = vcmask 523264   ;;  %vm534_vm2 = vmmov 0   ;;  %s668_s0 = inlined_call_operand.vmem [shape: bf16[16,128], index: 0, kind: input, shape index: {}]   ;;  %s669_s1 = inlined_call_operand.vmem [shape: bf16[64,16], index: 1, kind: input, shape index: {}]   ;;  %s670_s2 = inlined_call_operand.vmem [shape: f32[64,1], index: 2, kind: input, shape index: {}]   ;;  %s671_s4 = inlined_call_operand.vmem [shape: f32[64,1], index: 4, kind: input, shape index: {}]   ;;  %s672_s3 = inlined_call_operand.vmem [shape: bf16[64,64], index: 3, kind: input, shape index: {}]   ;;  %s673_s5 = inlined_call_operand.vmem [shape: bf16[16,64], index: 5, kind: input, shape index: {}]   ;;  %s674_s6 = inlined_call_operand.<no memory space> [shape: f32[1,1], index: 6, kind: input, shape index: {}]   ;;  %s675_s7 = inlined_call_operand.vmem [shape: f32[1,128], index: 7, kind: output, shape index: {}]  }
   0x1   :  { %v522_v0 = vld [vmem:[%s668_s0] sm:$0xff]   ;;  %520 = vset.pattern.permute.xlu0 %v532_v1  ;;  %521 = vset.pattern.permute.xlu1 %v532_v1  ;;  %v524_v3 = vld [vmem:[%s669_s1 + $0x8] sm:$0xff]   ;;  %v525_v4 = vld [vmem:[%s669_s1 + $0x10] sm:$0xff]  }
   0x2   :  { %v523_v2 = vld [vmem:[%s669_s1] sm:$0xff]   ;;  %479 = vmatprep.subr.bf16.mxu0 %v522_v0  ;;  %v40_v6 = vld [vmem:[%s670_s2 + $0x10] sm:$0xff]  ;;  %v39_v7 = vld [vmem:[%s670_s2 + $0x8] sm:$0xff] }
   0x3   :  { %480 = vmatpush3.bf16.msra.mxu0 %v522_v0  ;;  %481 = vmatprep.mubr.msk.bf16.mxu0 %vm112_vm0, %v523_v2  ;;  %v38_v5 = vld [vmem:[%s670_s2] sm:$0xff]  ;;  %v41_v8 = vld [vmem:[%s670_s2 + $0x18] sm:$0xff]  ;;  %v43_v11 = vld [vmem:[%s670_s2 + $0x28] sm:$0xff] }
   0x4   :  { %48 = vperm.xlu0 %520, %v38_v5   ;;  %58 = vperm.xlu1 %521, %v40_v6   ;;  %v526_v9 = vld [vmem:[%s669_s1 + $0x18] sm:$0xff]   ;;  %v42_v10 = vld [vmem:[%s670_s2 + $0x20] sm:$0xff]  ;;  %v44_v12 = vld [vmem:[%s670_s2 + $0x30] sm:$0xff]  ;;  %v533_v6 = vmov 0.0  }
   0x5   :  { %v45_v13 = vld [vmem:[%s670_s2 + $0x38] sm:$0xff]  ;;  %v218_v14 = vld [vmem:[%s671_s4] sm:$0xff]  ;;  %v219_v15 = vld [vmem:[%s671_s4 + $0x8] sm:$0xff]  ;;  %505 = vmatprep.subr.bf16.mxu0 %v533_v6 }
   0x6   :  { %482 = vmatmul.mubr.msk.bf16.vlgmr.msra.gmra.mrb[0].mxu0 %vm112_vm0, %v524_v3  ;;  %v220_v16 = vld [vmem:[%s671_s4 + $0x10] sm:$0xff]  ;;  %v221_v17 = vld [vmem:[%s671_s4 + $0x18] sm:$0xff]  ;;  %v222_v18 = vld [vmem:[%s671_s4 + $0x20] sm:$0xff] }
   0x7   :  { %485 = vmatprep.mubr.msk.bf16.mxu0 %vm112_vm0, %v525_v4  ;;  %v223_v19 = vld [vmem:[%s671_s4 + $0x28] sm:$0xff]  ;;  %v224_v20 = vld [vmem:[%s671_s4 + $0x30] sm:$0xff]  ;;  %v225_v21 = vld [vmem:[%s671_s4 + $0x38] sm:$0xff] }
   0x8   :  { %53 = vperm.xlu0 %520, %v39_v7   ;;  %63 = vperm.xlu1 %521, %v41_v8   ;;  %v527_v22 = vld [vmem:[%s672_s3] sm:$0xff]   ;;  %v528_v3 = vld [vmem:[%s672_s3 + $0x8] sm:$0xff]   ;;  %v529_v4 = vld [vmem:[%s672_s3 + $0x10] sm:$0xff]  }
   0x9   :  { %497 = vmatprep.mubr.msk.bf16.mxu1 %vm286_vm1, %v527_v22  ;;  %v530_v5 = vld [vmem:[%s672_s3 + $0x18] sm:$0xff]  }
   0xc   :  { %68 = vperm.xlu0 %520, %v42_v10   ;;  %73 = vperm.xlu1 %521, %v43_v11  }
   0xe   :  { %486 = vmatmul.mubr.msk.bf16.gmra.mrb[4].mxu0 %vm112_vm0, %v526_v9 }
   0xf   :  { %513 = vmatprep.mubr.msk.bf16.mxu0 %vm534_vm2, %v533_v6 }
  0x10   :  { %78 = vperm.xlu0 %520, %v44_v12   ;;  %83 = vperm.xlu1 %521, %v45_v13  }
  0x14   :  { %228 = vperm.xlu0 %520, %v218_v14   ;;  %233 = vperm.xlu1 %521, %v219_v15  }
  0x18   :  { %238 = vperm.xlu0 %520, %v220_v16   ;;  %243 = vperm.xlu1 %521, %v221_v17  }
  0x1c   :  { %248 = vperm.xlu0 %520, %v222_v18   ;;  %253 = vperm.xlu1 %521, %v223_v19  }
  0x20   :  { %258 = vperm.xlu0 %520, %v224_v20   ;;  %263 = vperm.xlu1 %521, %v225_v21  }
  0x83   :  { %v49_v23 = vpop.permute.xlu0 %48  ;;  %v59_v24 = vpop.permute.xlu1 %58 }
  0x87   :  { %v54_v25 = vpop.permute.xlu0 %53  ;;  %v64_v26 = vpop.permute.xlu1 %63 }
  0x8b   :  { %v69_v30 = vpop.permute.xlu0 %68  ;;  %v74_v36 = vpop.permute.xlu1 %73 }
  0x8f   :  { %v79_v43 = vpop.permute.xlu0 %78  ;;  %v84_v50 = vpop.permute.xlu1 %83 }
  0x93   :  { %v229_v7 = vpop.permute.xlu0 %228  ;;  %v234_v8 = vpop.permute.xlu1 %233 }
  0x97   :  { %v239_v9 = vpop.permute.xlu0 %238  ;;  %v244_v10 = vpop.permute.xlu1 %243 }
  0x9b   :  { %v249_v14 = vpop.permute.xlu0 %248  ;;  %v254_v20 = vpop.permute.xlu1 %253 }
  0xd9   :  { %v483_v27 = vpop.f32.mrb[0].mxu0 }
  0xda   :  { %v168_v28 = vadd.f32 %v483_v27, %v59_v24  ;;  %v159_v29 = vpop.f32.mrb[1].mxu0  ;;  %v259_v27 = vpop.permute.xlu0 %258 }
  0xdb   :  { %v160_v31 = vadd.f32 %v159_v29, %v49_v23  ;;  %v484_v32 = vpop.f32.mrb[2].mxu0 }
  0xdc   :  { %v192_v33 = vmul.f32 0.1, %v168_v28  ;;  %v171_v34 = vadd.f32 %v484_v32, %v64_v26  ;;  %v162_v35 = vpop.f32.mrb[3].mxu0 }
  0xdd   :  { %v190_v37 = vmul.f32 0.1, %v160_v31  ;;  %v163_v38 = vadd.f32 %v162_v35, %v54_v25 }
  0xde   :  { %v193_v39 = vmul.f32 0.1, %v171_v34  ;;  %v200_v41 = vmax.f32 %v168_v28, %v192_v33 }
  0xdf   :  { %v191_v40 = vmul.f32 0.1, %v163_v38  ;;  %v198_v44 = vmax.f32 %v160_v31, %v190_v37 }
  0xe0   :  { %v201_v42 = vmax.f32 %v171_v34, %v193_v39  ;;  %v264_v34 = vpop.permute.xlu1 %263 }
  0xe1   :  { %v199_v45 = vmax.f32 %v163_v38, %v191_v40  ;;  %v487_v46 = vpop.f32.mrb[4].mxu0 }
  0xe2   :  { %v184_v47 = vadd.f32 %v487_v46, %v79_v43  ;;  %v175_v48 = vpop.f32.mrb[5].mxu0  ;;  %v215_v49 = vpack.c.bf16 %v201_v42, %v200_v41 }
  0xe3   :  { %v176_v51 = vadd.f32 %v175_v48, %v69_v30  ;;  %v488_v52 = vpop.f32.mrb[6].mxu0  ;;  %v214_v53 = vpack.c.bf16 %v199_v45, %v198_v44 }
  0xe4   :  { %v196_v54 = vmul.f32 0.1, %v184_v47  ;;  %v187_v55 = vadd.f32 %v488_v52, %v84_v50  ;;  %v178_v56 = vpop.f32.mrb[7].mxu0  ;;  %v435_v52 = vstv %s674_s6 }
  0xe5   :  { %v194_v57 = vmul.f32 0.1, %v176_v51  ;;  %v179_v58 = vadd.f32 %v178_v56, %v74_v36  ;;  %489 = vmatprep.subr.bf16.mxu1 %v214_v53 }
  0xe6   :  { %v197_v59 = vmul.f32 0.1, %v187_v55  ;;  %490 = vmatpush3.bf16.msra.mxu1 %v214_v53  ;;  %v204_v61 = vmax.f32 %v184_v47, %v196_v54 }
  0xe7   :  { %v195_v60 = vmul.f32 0.1, %v179_v58  ;;  %491 = vmatprep.subr.bf16.mxu1 %v215_v49  ;;  %v202_v63 = vmax.f32 %v176_v51, %v194_v57  ;;  %v531_v51 = vld [vmem:[%s673_s5] sm:$0xff]  }
  0xe8   :  { %v205_v62 = vmax.f32 %v187_v55, %v197_v59 }
  0xe9   :  { %v203_v0 = vmax.f32 %v179_v58, %v195_v60 }
  0xea   :  { %492 = vmatpush3.bf16.msra.mxu1 %v215_v49  ;;  %v217_v1 = vpack.c.bf16 %v205_v62, %v204_v61 }
  0xeb   :  { %v216_v2 = vpack.c.bf16 %v203_v0, %v202_v63 }
  0xed   :  { %493 = vmatprep.subr.bf16.mxu1 %v216_v2 }
  0xee   :  { %494 = vmatpush3.bf16.msra.mxu1 %v216_v2 }
  0xef   :  { %495 = vmatprep.subr.bf16.mxu1 %v217_v1 }
  0xf2   :  { %496 = vmatpush3.bf16.msra.mxu1 %v217_v1 }
  0xf5   :  { %498 = vmatmul.mubr.msk.bf16.vlgmr.msra.gmra.mrb[0].mxu1 %vm286_vm1, %v528_v3 }
  0xf6   :  { %501 = vmatprep.mubr.msk.bf16.mxu1 %vm286_vm1, %v529_v4 }
  0xfd   :  { %502 = vmatmul.mubr.msk.bf16.gmra.mrb[4].mxu1 %vm286_vm1, %v530_v5 }
 0x1c8   :  { %v499_v11 = vpop.f32.mrb[0].mxu1 }
 0x1c9   :  { %v342_v12 = vadd.f32 %v499_v11, %v239_v9  ;;  %v333_v13 = vpop.f32.mrb[1].mxu1 }
 0x1ca   :  { %v334_v15 = vadd.f32 %v333_v13, %v229_v7  ;;  %v500_v16 = vpop.f32.mrb[2].mxu1 }
 0x1cb   :  { %v366_v17 = vmul.f32 0.1, %v342_v12  ;;  %v345_v18 = vadd.f32 %v500_v16, %v244_v10  ;;  %v336_v19 = vpop.f32.mrb[3].mxu1 }
 0x1cc   :  { %v364_v21 = vmul.f32 0.1, %v334_v15  ;;  %v337_v22 = vadd.f32 %v336_v19, %v234_v8 }
 0x1cd   :  { %v367_v23 = vmul.f32 0.1, %v345_v18  ;;  %v374_v25 = vmax.f32 %v342_v12, %v366_v17 }
 0x1ce   :  { %v365_v24 = vmul.f32 0.1, %v337_v22  ;;  %v372_v28 = vmax.f32 %v334_v15, %v364_v21 }
 0x1cf   :  { %v375_v26 = vmax.f32 %v345_v18, %v367_v23 }
 0x1d0   :  { %v373_v29 = vmax.f32 %v337_v22, %v365_v24  ;;  %v503_v30 = vpop.f32.mrb[4].mxu1 }
 0x1d1   :  { %v383_v31 = vpack.c.bf16 %v375_v26, %v374_v25  ;;  %v358_v32 = vadd.f32 %v503_v30, %v259_v27  ;;  %v349_v33 = vpop.f32.mrb[5].mxu1 }
 0x1d2   :  { %v382_v35 = vpack.c.bf16 %v373_v29, %v372_v28  ;;  %v350_v36 = vadd.f32 %v349_v33, %v249_v14  ;;  %v504_v37 = vpop.f32.mrb[6].mxu1 }
 0x1d3   :  { %v370_v38 = vmul.f32 0.1, %v358_v32  ;;  %v361_v39 = vadd.f32 %v504_v37, %v264_v34  ;;  %v352_v40 = vpop.f32.mrb[7].mxu1 }
 0x1d4   :  { %v368_v41 = vmul.f32 0.1, %v350_v36  ;;  %v353_v42 = vadd.f32 %v352_v40, %v254_v20  ;;  %506 = vmatpush3.bf16.msra.mxu0 %v382_v35 }
 0x1d5   :  { %v371_v43 = vmul.f32 0.1, %v361_v39  ;;  %507 = vmatprep.subr.bf16.mxu0 %v533_v6  ;;  %v378_v45 = vmax.f32 %v358_v32, %v370_v38 }
 0x1d6   :  { %v369_v44 = vmul.f32 0.1, %v353_v42  ;;  %v376_v47 = vmax.f32 %v350_v36, %v368_v41 }
 0x1d7   :  { %v379_v46 = vmax.f32 %v361_v39, %v371_v43 }
 0x1d8   :  { %v377_v48 = vmax.f32 %v353_v42, %v369_v44  ;;  %508 = vmatpush3.bf16.msra.mxu0 %v383_v31 }
 0x1d9   :  { %v385_v49 = vpack.c.bf16 %v379_v46, %v378_v45  ;;  %509 = vmatprep.subr.bf16.mxu0 %v533_v6 }
 0x1da   :  { %v384_v50 = vpack.c.bf16 %v377_v48, %v376_v47 }
 0x1dc   :  { %510 = vmatpush3.bf16.msra.mxu0 %v384_v50 }
 0x1dd   :  { %511 = vmatprep.subr.bf16.mxu0 %v533_v6 }
 0x1e0   :  { %512 = vmatpush3.bf16.msra.mxu0 %v385_v49 }
 0x1e3   :  { %514 = vmatmul.mubr.msk.bf16.vlgmr.msra.gmra.mrb[8].mxu0 %vm286_vm1, %v531_v51 }
 0x2b6   :  { %v428_v53 = vpop.f32.mrb[8].mxu0 }
 0x2b7   :  { %v436_v54 = vadd.f32 %v435_v52, %v428_v53  ;;  %v515_v55 = vpop.f32.mrb[9].mxu0 }
 0x2b8   :  { %v431_v56 = vpop.f32.mrb[10].mxu0 }
 0x2b9   :  { %437 = vst [vmem:[%s675_s7] sm:$0x1] %v436_v54  ;;  %v516_v57 = vpop.f32.mrb[11].mxu0 }

</bundles_post_ra>
